<compile_context>
chip_gen: v7x
topology: tpu7x:2x2x1
jax: 0.10.0
libtpu: 0.0.40
codegen_flags: <defaults>
</compile_context>

<pallas_src>
import jax
import jax.numpy as jnp
from jax.experimental import pallas as pl
from jax.experimental.pallas import tpu as pltpu


def _round_up(x, m):
    return (x + m - 1) // m * m


def _mha_attention_kernel(x_ref, w1t_ref, b1_ref, w2_ref, b2_ref, o_ref):
    # X streams in as unpadded f32; cast to bf16 in-VMEM for the MXU.
    x = x_ref[...].astype(jnp.bfloat16)
    # First matmul: (TM, F) @ (F, Ap), bf16 operands, f32 accumulate.
    y = jnp.dot(x, w1t_ref[...], preferred_element_type=jnp.float32)
    y = jnp.tanh(y + b1_ref[...])               # bias-add + tanh in f32
    # TODO(synk): dropout is identity in eval mode (training=False); no RNG applied.
    # Second matmul: per-head inner product as dense block-diag matmul
    # (TM, Ap) @ (Ap, H); y stays in f32 (no bf16 repack — free accuracy).
    s = jnp.dot(y, w2_ref[...], preferred_element_type=jnp.float32)
    o_ref[...] = (s + b2_ref[...]).astype(o_ref.dtype)


def pack_mha_params(w1, b1, w2, b2, num_heads, dim_heads):
    """One-time parameter packing (do this at parameter-load time, not per call)."""
    atn_dim = num_heads * dim_heads
    feat = w1.shape[1]
    Ap = _round_up(atn_dim, 128)   # lane-pad the hidden/attention dim only

    # W1 (A, F) -> W1^T (F, A), zero-pad A -> Ap; bf16 MXU operand.
    # K dim (F) is left unpadded — the X blocks use the full array dim.
    w1t = jnp.pad(jnp.transpose(w1),
                  ((0, 0), (0, Ap - atn_dim))).astype(jnp.bfloat16)
    b1r = jnp.pad(b1.reshape(1, atn_dim),
                  ((0, 0), (0, Ap - atn_dim))).astype(jnp.float32)

    # W2 (1,1,H,Dh,1) -> (H,Dh) -> block-diagonal (A, H), zero-pad A -> Ap.
    # Kept in f32 (tiny, VMEM-resident; keeps the second matmul fully f32).
    w2hd = w2.reshape(num_heads, dim_heads).astype(jnp.float32)
    w2mat = (jnp.eye(num_heads, dtype=jnp.float32)[:, None, :]
             * w2hd[:, :, None]).reshape(atn_dim, num_heads)
    w2mat = jnp.pad(w2mat, ((0, Ap - atn_dim), (0, 0)))
    b2r = b2.reshape(1, num_heads).astype(jnp.float32)
    return w1t, b1r, w2mat, b2r


def multi_head_attention_forward(x, packed_params, num_heads, *, tm=1024):
    """x: (batch, nb_tiles, feature_depth) -> (batch, nb_tiles, num_heads)"""
    w1t, b1r, w2mat, b2r = packed_params
    bs, nbt, feat = x.shape
    M = bs * nbt
    F, Ap = w1t.shape
    assert F == feat
    H = w2mat.shape[1]

    # Row tile: multiple of 8 (sublane rule). Cap so the grid keeps >=2 steps
    # (v7x megacore sharding of the single "parallel" axis); VMEM headroom is
    # huge (~0.5 MiB/step at TM=1024) so tm=1024..4096 is a safe sweep range.
    TM = max(8, min(tm, _round_up(pl.cdiv(M, 2), 8)))
    grid = (pl.cdiv(M, TM),)     # no row padding; Pallas handles the tail block

    x2d = x.reshape(M, F)        # reshape only — no pad, no dtype cast, no copy

    cost = pl.CostEstimate(
        flops=2 * M * F * Ap + 2 * M * Ap * H,
        transcendentals=M * Ap,
        bytes_accessed=(M * F * 4            # X read (f32, unpadded)
                        + F * Ap * 2         # W1^T (bf16, resident)
                        + Ap * 4 + Ap * H * 4 + H * 4
                        + M * H * 4),        # narrow f32 output write
    )

    out2d = pl.pallas_call(
        _mha_attention_kernel,
        out_shape=jax.ShapeDtypeStruct((M, H), jnp.float32),
        grid=grid,
        in_specs=[
            # X: streamed over rows; last dim = full array dim (legal even
            # though F < 128).
            pl.BlockSpec((TM, F), lambda i: (i, 0)),
            # Weights / biases: constant index maps -> resident in VMEM.
            pl.BlockSpec((F, Ap), lambda i: (0, 0)),
            pl.BlockSpec((1, Ap), lambda i: (0, 0)),
            pl.BlockSpec((Ap, H), lambda i: (0, 0)),
            pl.BlockSpec((1, H), lambda i: (0, 0)),
        ],
        # Narrow output block: last dim = full array dim (num_heads). The
        # masked store costs a VMEM slot, not HBM bytes (HBM DMA is binding).
        out_specs=pl.BlockSpec((TM, H), lambda i: (i, 0)),
        compiler_params=pltpu.CompilerParams(
            dimension_semantics=("parallel",)),
        cost_estimate=cost,
    )(x2d, w1t, b1r, w2mat, b2r)

    # Pure metadata reshape — no post-kernel slice copy.
    return out2d.reshape(bs, nbt, num_heads)


def _reference(x, w1, b1, w2, b2, num_heads, dim_heads):
    bs, nbt, _ = x.shape
    y = jnp.tanh(jnp.einsum("btf,af->bta", x, w1) + b1)
    y = y.reshape(bs, nbt, num_heads, 1, dim_heads)
    s = jnp.matmul(y, jnp.broadcast_to(w2, (bs, nbt, num_heads, dim_heads, 1)))
    s = s + b2.reshape(1, 1, num_heads, 1, 1)
    return s.reshape(bs, nbt, num_heads)


if __name__ == "__main__":
    # Small, module-consistent shapes.
    batch, nb_tiles = 2, 8
    feature_depth = 32
    num_heads, dim_heads = 4, 32
    atn_dim = num_heads * dim_heads          # 128

    key = jax.random.PRNGKey(0)
    kx, kw1, kw2 = jax.random.split(key, 3)

    x = jax.random.normal(kx, (batch, nb_tiles, feature_depth), dtype=jnp.float32)

    # xavier_uniform-style deterministic init
    lim1 = (6.0 / (atn_dim + feature_depth)) ** 0.5
    w1 = jax.random.uniform(kw1, (atn_dim, feature_depth),
                            minval=-lim1, maxval=lim1, dtype=jnp.float32)
    b1 = jnp.zeros((atn_dim,), jnp.float32)

    lim2 = (6.0 / (dim_heads + 1)) ** 0.5
    w2 = jax.random.uniform(kw2, (1, 1, num_heads, dim_heads, 1),
                            minval=-lim2, maxval=lim2, dtype=jnp.float32)
    b2 = jnp.zeros((1, num_heads, 1, 1), jnp.float32)

    # Pack parameters once (hoisted out of the per-call path).
    packed = pack_mha_params(w1, b1, w2, b2, num_heads, dim_heads)
    packed = jax.tree_util.tree_map(jax.block_until_ready, packed)

    out = multi_head_attention_forward(x, packed, num_heads)
    out = jax.block_until_ready(out)

    ref = _reference(x, w1, b1, w2, b2, num_heads, dim_heads)
    assert out.shape == (batch, nb_tiles, num_heads)
    # bf16 operands on the first matmul -> looser tolerance than f32 reference.
    assert jnp.allclose(out, ref, atol=3e-2, rtol=3e-2), (
        float(jnp.max(jnp.abs(out - ref))))
    print("KERNEL_OK")
</pallas_src>

<mosaic_0001>
module attributes {stable_mosaic.version = 11 : i64} {
  func.func @_mha_attention_kernel(%arg0: i32, %arg1: memref<8x32xf32, #tpu.memory_space<vmem>>, %arg2: memref<32x128xbf16, #tpu.memory_space<vmem>>, %arg3: memref<1x128xf32, #tpu.memory_space<vmem>>, %arg4: memref<128x4xf32, #tpu.memory_space<vmem>>, %arg5: memref<1x4xf32, #tpu.memory_space<vmem>>, %arg6: memref<8x4xf32, #tpu.memory_space<vmem>>) attributes {dimension_semantics = [#tpu.dimension_semantics<parallel>], iteration_bounds = array<i64: 2>, scalar_prefetch = 0 : i64, scratch_operands = 0 : i64, tpu.core_type = #tpu.core_type<tc>, window_params = [{transform_indices = @transform_0, window_bounds = array<i64: 8, 32>}, {pipeline_mode = #tpu.pipeline_mode<synchronous>, transform_indices = @transform_1, window_bounds = array<i64: 32, 128>}, {pipeline_mode = #tpu.pipeline_mode<synchronous>, transform_indices = @transform_2, window_bounds = array<i64: 1, 128>}, {pipeline_mode = #tpu.pipeline_mode<synchronous>, transform_indices = @transform_3, window_bounds = array<i64: 128, 4>}, {pipeline_mode = #tpu.pipeline_mode<synchronous>, transform_indices = @transform_4, window_bounds = array<i64: 1, 4>}, {transform_indices = @transform_5, window_bounds = array<i64: 8, 4>}]} {
    %c0 = arith.constant 0 : index
    %c0_0 = arith.constant 0 : index
    %0 = vector.load %arg1[%c0, %c0_0] : memref<8x32xf32, #tpu.memory_space<vmem>>, vector<8x32xf32>
    %1 = arith.truncf %0 : vector<8x32xf32> to vector<8x32xbf16>
    %c0_1 = arith.constant 0 : index
    %c0_2 = arith.constant 0 : index
    %2 = vector.load %arg2[%c0_1, %c0_2] : memref<32x128xbf16, #tpu.memory_space<vmem>>, vector<32x128xbf16>
    %cst = arith.constant dense<0.000000e+00> : vector<8x128xf32>
    %3 = tpu.matmul %1, %2, %cst {dimension_numbers = #tpu.dot_dimension_numbers<[1], [0], [0], [1], [0, 0, 1, 1], [], []>} : vector<8x32xbf16>, vector<32x128xbf16>, vector<8x128xf32> -> vector<8x128xf32>
    %c0_3 = arith.constant 0 : index
    %c0_4 = arith.constant 0 : index
    %4 = vector.load %arg3[%c0_3, %c0_4] : memref<1x128xf32, #tpu.memory_space<vmem>>, vector<1x128xf32>
    %5 = vector.broadcast %4 : vector<1x128xf32> to vector<8x128xf32>
    %6 = arith.addf %3, %5 : vector<8x128xf32>
    %7 = math.tanh %6 : vector<8x128xf32>
    %c0_5 = arith.constant 0 : index
    %c0_6 = arith.constant 0 : index
    %8 = vector.load %arg4[%c0_5, %c0_6] : memref<128x4xf32, #tpu.memory_space<vmem>>, vector<128x4xf32>
    %cst_7 = arith.constant dense<0.000000e+00> : vector<8x4xf32>
    %9 = tpu.matmul %7, %8, %cst_7 {dimension_numbers = #tpu.dot_dimension_numbers<[1], [0], [0], [1], [0, 0, 1, 1], [], []>} : vector<8x128xf32>, vector<128x4xf32>, vector<8x4xf32> -> vector<8x4xf32>
    %c0_8 = arith.constant 0 : index
    %c0_9 = arith.constant 0 : index
    %10 = vector.load %arg5[%c0_8, %c0_9] : memref<1x4xf32, #tpu.memory_space<vmem>>, vector<1x4xf32>
    %11 = vector.broadcast %10 : vector<1x4xf32> to vector<8x4xf32>
    %12 = arith.addf %9, %11 : vector<8x4xf32>
    %c0_10 = arith.constant 0 : index
    %c0_11 = arith.constant 0 : index
    %13 = vector.load %arg6[%c0_10, %c0_11] : memref<8x4xf32, #tpu.memory_space<vmem>>, vector<8x4xf32>
    tpu.vector_store %arg6[%c0_10, %c0_11], %12 {strides = array<i32>} : memref<8x4xf32, #tpu.memory_space<vmem>>, vector<8x4xf32>,
    return
  }
  func.func @transform_0(%arg0: i32) -> (i32, i32) {
    %c0_i32 = arith.constant 0 : i32
    %c0_i32_0 = arith.constant 0 : i32
    return %arg0, %c0_i32 : i32, i32
  }
  func.func @transform_1(%arg0: i32) -> (i32, i32) {
    %c0_i32 = arith.constant 0 : i32
    %c0_i32_0 = arith.constant 0 : i32
    %c0_i32_1 = arith.constant 0 : i32
    return %c0_i32, %c0_i32_0 : i32, i32
  }
  func.func @transform_2(%arg0: i32) -> (i32, i32) {
    %c0_i32 = arith.constant 0 : i32
    %c0_i32_0 = arith.constant 0 : i32
    %c0_i32_1 = arith.constant 0 : i32
    return %c0_i32, %c0_i32_0 : i32, i32
  }
  func.func @transform_3(%arg0: i32) -> (i32, i32) {
    %c0_i32 = arith.constant 0 : i32
    %c0_i32_0 = arith.constant 0 : i32
    %c0_i32_1 = arith.constant 0 : i32
    return %c0_i32, %c0_i32_0 : i32, i32
  }
  func.func @transform_4(%arg0: i32) -> (i32, i32) {
    %c0_i32 = arith.constant 0 : i32
    %c0_i32_0 = arith.constant 0 : i32
    %c0_i32_1 = arith.constant 0 : i32
    return %c0_i32, %c0_i32_0 : i32, i32
  }
  func.func @transform_5(%arg0: i32) -> (i32, i32) {
    %c0_i32 = arith.constant 0 : i32
    %c0_i32_0 = arith.constant 0 : i32
    return %arg0, %c0_i32 : i32, i32
  }
}

</mosaic_0001>

<bundles_post_ra>
// kernel: tpu_custom_call.1
= control target key start
LH: loop header
LB: loop body
LE: loop exit
PB: predicated region body
PF: predicated region fallthrough
CT: control target
= control target key end

     0   :  { %s596_s18 = smov 0   ;;  %s680_s0 = inlined_call_operand.vmem [shape: f32[16,32], index: 0, kind: input, shape index: {}]   ;;  %s681_s1 = inlined_call_operand.vmem [shape: bf16[32,128], index: 1, kind: input, shape index: {}]   ;;  %s682_s2 = inlined_call_operand.vmem [shape: f32[1,128], index: 2, kind: input, shape index: {}]   ;;  %s683_s3 = inlined_call_operand.vmem [shape: f32[128,4], index: 3, kind: input, shape index: {}]   ;;  %s684_s4 = inlined_call_operand.vmem [shape: f32[1,4], index: 4, kind: input, shape index: {}]   ;;  %s685_s5 = inlined_call_operand.vmem [shape: f32[16,4], index: 5, kind: output, shape index: {}]  }
   0x1 LB: > { %s439_s19 = sadd.s32 4294967295, %s561_s18   ;;  %p443_p0 = scmp.ge.s32.totalorder %s561_s18, 1  ;;  %s561_s18 = sphi %s596_s18, %s15_s18  }
   0x2   : > { %p186_p1 = scmp.lt.s32.totalorder %s561_s18, 3 }
   0x4   : > { %p187_p2 = pnand %p443_p0, %p186_p1 }
   0x5   : > { %v551_v0 = vld [vmem:[%s681_s1] sm:$0xff] (!%p187_p2)   ;;  %v563_v1 = vmov (!%p187_p2), 0.0   ;;  %v552_v2 = vld [vmem:[%s681_s1 + $0x8] sm:$0xff] (!%p187_p2)   ;;  %vm564_vm0 = vmmov (!%p187_p2), 0   ;;  %p212_p3 = scmp.lt.s32.totalorder (!%p187_p2), %s439_s19, 1  ;;  %v293_v5 = vld [vmem:[%s683_s3 + $0x10] sm:$0xff] (!%p187_p2) }
   0x6   : > { %190 = sbr.rel (%p187_p2) target bundleno = 459 (0x1cb), region = 40  ;;  %473 = vmatprep.subr.bf16.mxu0 (!%p187_p2), %v563_v1  ;;  %477 = vmatprep.mubr.msk.bf16.mxu0 (!%p187_p2), %vm564_vm0, %v563_v1  ;;  %v291_v3 = vld [vmem:[%s683_s3] sm:$0xff] (!%p187_p2)  ;;  %v292_v4 = vld [vmem:[%s683_s3 + $0x8] sm:$0xff] (!%p187_p2)  ;;  %v565_v6 = vmov (!%p187_p2), 0.0|0.0   ;;  %v294_v8 = vld [vmem:[%s683_s3 + $0x18] sm:$0xff] (!%p187_p2)  ;;  %vm246_vm1 = vcmask (!%p187_p2), 261120  }
   0x7   : > { %474 = vmatpush3.bf16.msra.mxu0 (!%p187_p2), %v551_v0  ;;  %516 = vmatprep.subr.bf16.mxu1 (!%p187_p2), %v565_v6  ;;  %v517_v7 = vpack.c.bf16 (!%p187_p2), %v292_v4, %v291_v3  ;;  %v520_v9 = vpack.c.bf16 (!%p187_p2), %v294_v8, %v293_v5  ;;  %v295_v10 = vld [vmem:[%s683_s3 + $0x20] sm:$0xff] (!%p187_p2)  ;;  %v296_v11 = vld [vmem:[%s683_s3 + $0x28] sm:$0xff] (!%p187_p2)  ;;  %v297_v15 = vld [vmem:[%s683_s3 + $0x30] sm:$0xff] (!%p187_p2)  ;;  %vm384_vm2 = vcmask (!%p187_p2), 31744  }
   0x8   : > { %475 = vmatprep.subr.bf16.mxu0 (!%p187_p2), %v563_v1  ;;  %513 = vmatprep.mubr.msk.f32.mxu1 (!%p187_p2), %vm564_vm0, %v563_v1  ;;  %v523_v14 = vpack.c.bf16 (!%p187_p2), %v296_v11, %v295_v10  ;;  %v298_v16 = vld [vmem:[%s683_s3 + $0x38] sm:$0xff] (!%p187_p2)  ;;  %v299_v18 = vld [vmem:[%s683_s3 + $0x40] sm:$0xff] (!%p187_p2)  ;;  %v300_v19 = vld [vmem:[%s683_s3 + $0x48] sm:$0xff] (!%p187_p2) }
   0x9   : > { %518 = vmatpush3.bf16.msra.mxu1 (!%p187_p2), %v517_v7  ;;  %v526_v17 = vpack.c.bf16 (!%p187_p2), %v298_v16, %v297_v15  ;;  %v529_v20 = vpack.c.bf16 (!%p187_p2), %v300_v19, %v299_v18  ;;  %v301_v21 = vld [vmem:[%s683_s3 + $0x50] sm:$0xff] (!%p187_p2)  ;;  %v302_v22 = vld [vmem:[%s683_s3 + $0x58] sm:$0xff] (!%p187_p2)  ;;  %v303_v24 = vld [vmem:[%s683_s3 + $0x60] sm:$0xff] (!%p187_p2) }
   0xa   : > { %519 = vmatprep.subr.bf16.mxu1 (!%p187_p2), %v565_v6  ;;  %v532_v23 = vpack.c.bf16 (!%p187_p2), %v302_v22, %v301_v21  ;;  %v304_v25 = vld [vmem:[%s683_s3 + $0x68] sm:$0xff] (!%p187_p2)  ;;  %v305_v27 = vld [vmem:[%s683_s3 + $0x70] sm:$0xff] (!%p187_p2)  ;;  %v306_v28 = vld [vmem:[%s683_s3 + $0x78] sm:$0xff] (!%p187_p2) }
   0xb   : > { %476 = vmatpush3.bf16.msra.mxu0 (!%p187_p2), %v552_v2  ;;  %v535_v26 = vpack.c.bf16 (!%p187_p2), %v304_v25, %v303_v24  ;;  %v538_v29 = vpack.c.bf16 (!%p187_p2), %v306_v28, %v305_v27  ;;  %v446_v30 = vld [vmem:[%s682_s2] ss:$0 sm:$0xff] (!%p187_p2) }
   0xc   : > { %v450_v37 = vld [vmem:[%s684_s4] ss:$0 sm:$0xff] (!%p187_p2) }
   0xd   : > { %s687_s19 = smov (!%p212_p3, %s439_s19), 1  ;;  %521 = vmatpush3.bf16.msra.mxu1 %v520_v9 }
   0xe   : > { %s444_s7 = sshll.u32 %s687_s19, 3  ;;  %522 = vmatprep.subr.bf16.mxu1 %v565_v6 }
   0xf   : > { %s215_s14 = scalar_lea.vmem %s680_s0, %s444_s7  ;;  %s219_s21 = scalar_lea.vmem %s685_s5, %s444_s7 }
  0x10   : > { %v221_v12 = vld [vmem:[%s215_s14] sm:$0xff] }
  0x11   : > { %v222_v13 = vpack.c.bf16 %v221_v12, %v221_v12  ;;  %524 = vmatpush3.bf16.msra.mxu1 %v523_v14 }
  0x12   : > { %525 = vmatprep.subr.bf16.mxu1 %v565_v6 }
  0x13   : > { %478 = vmatmul.mubr.msk.bf16.vlgmr.msra.gmra.mrb[0].mxu0 %vm246_vm1, %v222_v13 }
  0x15   : > { %527 = vmatpush3.bf16.msra.mxu1 %v526_v17 }
  0x16   : > { %528 = vmatprep.subr.bf16.mxu1 %v565_v6 }
  0x19   : > { %530 = vmatpush3.bf16.msra.mxu1 %v529_v20 }
  0x1a   : > { %531 = vmatprep.subr.bf16.mxu1 %v565_v6 }
  0x1d   : > { %533 = vmatpush3.bf16.msra.mxu1 %v532_v23 }
  0x1e   : > { %534 = vmatprep.subr.bf16.mxu1 %v565_v6 }
  0x21   : > { %536 = vmatpush3.bf16.msra.mxu1 %v535_v26 }
  0x22   : > { %537 = vmatprep.subr.bf16.mxu1 %v565_v6 }
  0x25   : > { %539 = vmatpush3.bf16.msra.mxu1 %v538_v29 }
  0xe6   : > { %v284_v31 = vpop.f32.mrb[0].mxu0 }
  0xe7   : > { %v285_v32 = vadd.f32 %v446_v30, %v284_v31  ;;  %v479_v33 = vpop.f32.mrb[1].mxu0 }
  0xe8   : > { %v287_v34 = vpop.f32.mrb[2].mxu0 }
  0xe9   : > { %553 = vtanh.f32 %v285_v32  ;;  %v480_v35 = vpop.f32.mrb[3].mxu0 }
  0xf3   : > { %v554_v36 = vpop.eup %553 }
  0xf4   : > { %514 = vmatmul.mubr.f32.vlgmr.msra.gmra.mrb[0].mxu1 %v554_v36 }
 0x1c7   : > { %v380_v38 = vpop.f32.mrb[0].mxu1 }
 0x1c8   : > { %v381_v39 = vadd.f32 %v450_v37, %v380_v38  ;;  %v515_v40 = vpop.f32.mrb[1].mxu1 }
 0x1ca   : > { %385 = vst.msk [vmem:[%s219_s21] sm:$0xff] %vm384_vm2, %v381_v39 }
 0x1cb PF: > { %s15_s18 = sadd.s32 1, %s561_s18  }
 0x1cc   : > { %p12_p4 = scmp.ge.s32.totalorder %s15_s18, 4  }
 0x1ce   :  { %14 = sbr.rel (!%p12_p4) target bundleno = 1 (0x1), region = 70 }

</bundles_post_ra>
